<compile_context>
chip_gen: v7x
topology: tpu7x:2x2x1
jax: 0.10.0
libtpu: 0.0.40
codegen_flags: <defaults>
</compile_context>

<pallas_src>
import functools
import math

import jax
import jax.numpy as jnp
from jax import lax
from jax.experimental import pallas as pl
from jax.experimental.pallas import tpu as pltpu


def _round_up(x, m):
    return ((x + m - 1) // m) * m


def _nbytes(*arrays):
    total = 0
    for a in arrays:
        total += math.prod(a.shape) * jnp.dtype(a.dtype).itemsize
    return int(total)


def _cparams(byte_estimate, dims=None):
    limit = int(min(max(byte_estimate, 32 * 1024 * 1024), 100 * 1024 * 1024))
    if dims is None:
        return pltpu.CompilerParams(vmem_limit_bytes=limit)
    return pltpu.CompilerParams(dimension_semantics=dims, vmem_limit_bytes=limit)


_VMEM_SPEC = pl.BlockSpec(memory_space=pltpu.MemorySpace.VMEM)


# ---------------------------------------------------------------------------
# Stage 1: z = reverse_layer(X); zn = row-normalized z   (whole-array, tiny)
# ---------------------------------------------------------------------------

def _reverse_norm_kernel(x_ref, rw_ref, rb_ref, zn_ref):
    f32 = jnp.float32
    x = x_ref[...].astype(jnp.bfloat16)            # bf16 MXU operand, f32 acc
    z = jnp.dot(x, rw_ref[...], preferred_element_type=f32) + rb_ref[...]
    sumsq = jnp.sum(z * z, axis=1, keepdims=True)
    # Reference get_similarity has no eps clamp (0-norm rows would give NaN in
    # torch); we guard zero-norm rows to 0 to keep everything finite.
    inv_norm = jnp.where(sumsq > 0.0, lax.rsqrt(sumsq), 0.0)
    zn_ref[...] = z * inv_norm


# ---------------------------------------------------------------------------
# Stage 2: S rows, per-row k-th-largest threshold, adj rows  (row-tiled grid)
# ---------------------------------------------------------------------------

def _sim_adj_kernel(n, topk, v, zn_ref, a_ref, s_ref, adj_ref):
    f32 = jnp.float32
    row_blk, n_pad = a_ref.shape
    np2 = pl.next_power_of_2(n_pad)

    i = pl.program_id(0)
    row_start = pl.multiple_of(i * row_blk, row_blk)

    zn_all = zn_ref[...]                               # (Np, C0) f32, resident
    zn_blk = zn_ref[pl.ds(row_start, row_blk), :]      # (row_blk, C0)

    # S rows = zn_blk @ zn_all.T, kept in f32 (top-k is rounding-sensitive).
    dis = lax.dot_general(zn_blk, zn_all, (((1,), (1,)), ((), ())),
                          preferred_element_type=f32)  # (row_blk, Np)

    col = lax.broadcasted_iota(jnp.int32, (row_blk, n_pad), 1)
    row_g = lax.broadcasted_iota(jnp.int32, (row_blk, n_pad), 0) + row_start
    invalid = jnp.logical_or(col >= n, row_g >= n)     # padded area
    s_blk = jnp.where(jnp.logical_or(row_g == col, invalid), 0.0, dis)
    s_ref[...] = s_blk

    # --- k-th largest per row: torch.topk(S, k, dim=1).values[:, -1] --------
    # Single fused key per element: monotone int32 encoding of the f32 value
    # in the high bits, bit-inverted column index in the low log2(np2) bits.
    # One max-reduce per knockout iteration (instead of max + min).
    neg_inf = jnp.float32(-jnp.inf)
    int_min = jnp.int32(jnp.iinfo(jnp.int32).min)
    cur = jnp.where(col < n, s_blk, neg_inf)           # padded cols never win
    bits = lax.bitcast_convert_type(cur, jnp.int32)
    mono = jnp.where(bits < 0,
                     jnp.bitwise_xor(bits, jnp.int32(0x7FFFFFFF)), bits)
    key = jnp.bitwise_or(jnp.bitwise_and(mono, jnp.int32(-np2)),
                         jnp.int32(np2 - 1) - col)
    for _ in range(topk - 1):
        max_key = jnp.max(key, axis=1, keepdims=True)  # one XLU pass
        knocked = key == max_key                       # exactly one per row
        cur = jnp.where(knocked, neg_inf, cur)
        key = jnp.where(knocked, int_min, key)
    thr = jnp.max(cur, axis=1, keepdims=True)          # k-th largest value

    s_out = s_blk * (s_blk >= thr).astype(f32)
    adj_ref[...] = (1.0 - v) * a_ref[...] + v * s_out


# ---------------------------------------------------------------------------
# Stage 3: GCN stack + P layer   (whole-array resident; adj is the big array)
# ---------------------------------------------------------------------------

def _gcn_kernel(layer_num, act, adj_ref, x_ref, *refs):
    # refs: [w0, b0, ..., w_{L-1}, b_{L-1}, P_w, P_b, emb_out, zp_out]
    f32, bf16 = jnp.float32, jnp.bfloat16
    pw_ref = refs[2 * layer_num]
    pb_ref = refs[2 * layer_num + 1]
    emb_ref = refs[2 * layer_num + 2]
    zp_ref = refs[2 * layer_num + 3]

    # TODO(synk): GNN_layer('GCN', ...) is not defined in the reference file;
    # assumed to be the standard propagation adj @ (X @ W + b).
    adj_bf = adj_ref[...].astype(bf16)                 # cast once, reuse per layer
    x_cur = x_ref[...]
    for i in range(layer_num):
        w = refs[2 * i][...]                           # bf16 (cast in wrapper)
        b = refs[2 * i + 1][...]                       # f32
        xw = jnp.dot(x_cur.astype(bf16), w, preferred_element_type=f32) + b
        x_cur = jnp.dot(adj_bf, xw.astype(bf16), preferred_element_type=f32)
        if act and i != layer_num - 1:
            x_cur = jnp.maximum(x_cur, 0.0)
    emb_ref[...] = x_cur
    zp = jnp.dot(x_cur.astype(bf16), pw_ref[...],
                 preferred_element_type=f32) + pb_ref[...]
    zp_ref[...] = zp


# ---------------------------------------------------------------------------
# Wrapper: pad to lane/MXU-friendly shapes, 3 pallas_calls, slice the outputs
# ---------------------------------------------------------------------------

def rgnn_forward(A_a, X_a, params, *, act=True, topk=5, v=0.5):
    n, n_in = X_a.shape
    gcn_w = params["gcn_w"]
    gcn_b = params["gcn_b"]
    layer_num = len(gcn_w)
    cfg = [w.shape[1] for w in gcn_w]

    f32, bf16 = jnp.float32, jnp.bfloat16
    n_pad = _round_up(n, 128)          # lane-dense S/adj stores, clean MXU dims
    n_in_p = _round_up(n_in, 128)
    cfg_p = [_round_up(c, 128) for c in cfg]
    c0_p = cfg_p[0]

    def pad2(x, r, c, dtype=f32):
        x = jnp.asarray(x, f32)
        return jnp.pad(x, ((0, r - x.shape[0]), (0, c - x.shape[1]))).astype(dtype)

    A_p = pad2(A_a, n_pad, n_pad)
    X_p = pad2(X_a, n_pad, n_in_p)
    rw_p = pad2(params["reverse_w"], n_in_p, c0_p, bf16)
    rb_p = pad2(params["reverse_b"], 1, c0_p)
    pw_p = pad2(params["P_w"], cfg_p[-1], n_in_p, bf16)
    pb_p = pad2(params["P_b"], 1, n_in_p)
    gcn_ops = []
    in_p = n_in_p
    for i in range(layer_num):
        gcn_ops.append(pad2(gcn_w[i], in_p, cfg_p[i], bf16))
        gcn_ops.append(pad2(gcn_b[i], 1, cfg_p[i]))
        in_p = cfg_p[i]

    # ---- stage 1: zn ------------------------------------------------------
    zn = pl.pallas_call(
        _reverse_norm_kernel,
        out_shape=jax.ShapeDtypeStruct((n_pad, c0_p), f32),
        in_specs=[_VMEM_SPEC] * 3,
        out_specs=_VMEM_SPEC,
        compiler_params=_cparams(3 * _nbytes(X_p, rw_p, rb_p)
                                 + 6 * n_pad * c0_p * 4),
    )(X_p, rw_p, rb_p)

    # ---- stage 2: S, threshold, adj (row-tiled, parallel) ------------------
    row_blk = 256 if n_pad % 256 == 0 else 128
    num_blocks = n_pad // row_blk
    row_spec = lambda: pl.BlockSpec((row_blk, n_pad), lambda i: (i, 0))
    sim_kernel = functools.partial(_sim_adj_kernel, n, int(topk), float(v))
    S_p, adj_p = pl.pallas_call(
        sim_kernel,
        grid=(num_blocks,),
        out_shape=(jax.ShapeDtypeStruct((n_pad, n_pad), f32),   # S
                   jax.ShapeDtypeStruct((n_pad, n_pad), f32)),  # adj
        in_specs=[_VMEM_SPEC,            # zn: whole array, VMEM resident
                  row_spec()],           # A rows: pipelined per block
        out_specs=(row_spec(), row_spec()),
        compiler_params=_cparams(2 * _nbytes(zn) + 14 * row_blk * n_pad * 4,
                                 dims=("parallel",)),
    )(zn, A_p)

    # ---- stage 3: GCN stack + P layer --------------------------------------
    max_c = max(cfg_p + [n_in_p])
    gcn_kernel = functools.partial(_gcn_kernel, layer_num, bool(act))
    emb_p, zp_p = pl.pallas_call(
        gcn_kernel,
        out_shape=(jax.ShapeDtypeStruct((n_pad, cfg_p[-1]), f32),  # emb
                   jax.ShapeDtypeStruct((n_pad, n_in_p), f32)),    # ZP
        in_specs=[_VMEM_SPEC] * (4 + 2 * layer_num),
        out_specs=(_VMEM_SPEC, _VMEM_SPEC),
        compiler_params=_cparams(3 * n_pad * n_pad * 4
                                 + 2 * _nbytes(X_p, pw_p, pb_p, *gcn_ops)
                                 + 8 * n_pad * max_c * 4),
    )(adj_p, X_p, *gcn_ops, pw_p, pb_p)

    return emb_p[:n, :cfg[-1]], zp_p[:n, :n_in], S_p[:n, :n]


# ---------------------------------------------------------------------------
# Parameter init (xavier uniform weights, zero bias) — matches torch init
# ---------------------------------------------------------------------------

def xavier_uniform(key, fan_in, fan_out):
    bound = math.sqrt(6.0 / (fan_in + fan_out))
    # stored as (in, out) so kernels compute x @ W directly (== torch x @ W.T)
    return jax.random.uniform(key, (fan_in, fan_out), jnp.float32, -bound, bound)


def init_params(key, n_in, cfg):
    ks = jax.random.split(key, 2 + len(cfg))
    params = {
        "reverse_w": xavier_uniform(ks[0], n_in, cfg[0]),
        "reverse_b": jnp.zeros((1, cfg[0]), jnp.float32),
        "P_w": xavier_uniform(ks[1], cfg[-1], n_in),
        "P_b": jnp.zeros((1, n_in), jnp.float32),
        "gcn_w": [],
        "gcn_b": [],
    }
    in_ch = n_in
    for i, out_ch in enumerate(cfg):
        params["gcn_w"].append(xavier_uniform(ks[2 + i], in_ch, out_ch))
        params["gcn_b"].append(jnp.zeros((1, out_ch), jnp.float32))
        in_ch = out_ch
    return params


# ---------------------------------------------------------------------------
if __name__ == "__main__":
    key = jax.random.PRNGKey(0)
    k_x, k_a, k_p = jax.random.split(key, 3)

    N, n_in = 16, 32
    cfg = [32, 16]

    X_a = jax.random.normal(k_x, (N, n_in), jnp.float32)
    A_raw = jax.random.uniform(k_a, (N, N), jnp.float32)
    A_a = (A_raw + A_raw.T) * 0.5          # symmetric non-negative adjacency

    params = init_params(k_p, n_in, cfg)

    emb, ZP, S = rgnn_forward(A_a, X_a, params)
    jax.block_until_ready((emb, ZP, S))

    assert emb.shape == (N, cfg[-1])
    assert ZP.shape == (N, n_in)
    assert S.shape == (N, N)
    assert bool(jnp.all(jnp.isfinite(emb)))
    assert bool(jnp.all(jnp.isfinite(ZP)))
    assert bool(jnp.all(jnp.isfinite(S)))
    print("KERNEL_OK")
</pallas_src>

<mosaic_0001>
module attributes {stable_mosaic.version = 11 : i64} {
  func.func @_reverse_norm_kernel(%arg0: memref<128x128xf32, #tpu.memory_space<vmem>>, %arg1: memref<128x128xbf16, #tpu.memory_space<vmem>>, %arg2: memref<1x128xf32, #tpu.memory_space<vmem>>, %arg3: memref<128x128xf32, #tpu.memory_space<vmem>>) attributes {dimension_semantics = [], scalar_prefetch = 0 : i64, scratch_operands = 0 : i64, tpu.core_type = #tpu.core_type<tc>} {
    %c0 = arith.constant 0 : index
    %c0_0 = arith.constant 0 : index
    %0 = vector.load %arg0[%c0, %c0_0] : memref<128x128xf32, #tpu.memory_space<vmem>>, vector<128x128xf32>
    %1 = arith.truncf %0 : vector<128x128xf32> to vector<128x128xbf16>
    %c0_1 = arith.constant 0 : index
    %c0_2 = arith.constant 0 : index
    %2 = vector.load %arg1[%c0_1, %c0_2] : memref<128x128xbf16, #tpu.memory_space<vmem>>, vector<128x128xbf16>
    %cst = arith.constant dense<0.000000e+00> : vector<128x128xf32>
    %3 = tpu.matmul %1, %2, %cst {dimension_numbers = #tpu.dot_dimension_numbers<[1], [0], [0], [1], [0, 0, 1, 1], [], []>} : vector<128x128xbf16>, vector<128x128xbf16>, vector<128x128xf32> -> vector<128x128xf32>
    %c0_3 = arith.constant 0 : index
    %c0_4 = arith.constant 0 : index
    %4 = vector.load %arg2[%c0_3, %c0_4] : memref<1x128xf32, #tpu.memory_space<vmem>>, vector<1x128xf32>
    %5 = vector.broadcast %4 : vector<1x128xf32> to vector<128x128xf32>
    %6 = arith.addf %3, %5 : vector<128x128xf32>
    %7 = arith.mulf %6, %6 : vector<128x128xf32>
    %cst_5 = arith.constant dense<0.000000e+00> : vector<128xf32>
    %8 = vector.multi_reduction <add>, %7, %cst_5 [1] : vector<128x128xf32> to vector<128xf32>
    %9 = vector.shape_cast %8 : vector<128xf32> to vector<128x1xf32>
    %cst_6 = arith.constant 0.000000e+00 : f32
    %10 = vector.broadcast %cst_6 : f32 to vector<128x1xf32>
    %11 = arith.cmpf ogt, %9, %10 : vector<128x1xf32>
    %12 = math.rsqrt %9 : vector<128x1xf32>
    %cst_7 = arith.constant 0.000000e+00 : f32
    %13 = vector.broadcast %cst_7 : f32 to vector<128x1xf32>
    %14 = arith.select %11, %12, %13 : vector<128x1xi1>, vector<128x1xf32>
    %15 = vector.broadcast %14 : vector<128x1xf32> to vector<128x128xf32>
    %16 = arith.mulf %6, %15 : vector<128x128xf32>
    %c0_8 = arith.constant 0 : index
    %c0_9 = arith.constant 0 : index
    %17 = vector.load %arg3[%c0_8, %c0_9] : memref<128x128xf32, #tpu.memory_space<vmem>>, vector<128x128xf32>
    tpu.vector_store %arg3[%c0_8, %c0_9], %16 {strides = array<i32>} : memref<128x128xf32, #tpu.memory_space<vmem>>, vector<128x128xf32>,
    return
  }
}

</mosaic_0001>

<bundles_post_ra>
// kernel: tpu_custom_call.1
= control target key start
LH: loop header
LB: loop body
LE: loop exit
PB: predicated region body
PF: predicated region fallthrough
CT: control target
= control target key end

     0   :  { %8 = vsyncpa [#allocation3], 0  ;;  %s726_s0 = inlined_call_operand.hbm [shape: f32[128,128], index: 0, kind: input, shape index: {}]   ;;  %s727_s1 = inlined_call_operand.hbm [shape: bf16[128,128], index: 1, kind: input, shape index: {}]   ;;  %s728_s2 = inlined_call_operand.vmem [shape: f32[1,128], index: 2, kind: input, shape index: {}]   ;;  %s729_s3 = inlined_call_operand.hbm [shape: f32[128,128], index: 3, kind: output, shape index: {}]  }
   0x1   :  { %9 = vsyncpa [#allocation6], 0 }
   0x2   :  { %10 = vsyncpa [#allocation4], 0  ;;  %s574_s12 = smov [#allocation2]   ;;  %s502_s16 = scalar_lea.hbm %s726_s0, 2048 }
   0x3   :  { %s16_s13 = sshll.u32 %s574_s12, 4  ;;  %p503_p0 = scmp.ne.s32.totalorder %s726_s0, %s502_s16  ;;  %s17_s13 = int_to_ptr.vmem [resolvable:$true] %s16_s13 }
   0x4   :  { %p506_p1 = scmp.lt.u32.totalorder %s502_s16, %s726_s0 }
   0x6   :  { %p508_p2 = pnand %p506_p1, %p503_p0 }
   0x8   :  { %511 = shalt.err (!%p508_p2)
}
   0x9   :  { %s512_s21 = scalar_lea.vmem %s17_s13, 2048  ;;  %p517_p4 = scmp.lt.s32.totalorder %s17_s13, %s17_s13 }
   0xa   :  { %p513_p3 = scmp.ne.s32.totalorder %s17_s13, %s512_s21  ;;  %p518_p5 = scmp.lt.s32.totalorder %s512_s21, %s512_s21 }
   0xc   :  { %p519_p6 = por %p518_p5, %p517_p4 }
   0xe   :  { %p520_p7 = pnand %p519_p6, %p513_p3 }
  0x10   :  { %523 = shalt.err (!%p520_p7)
}
  0x11   :  { %s575_s22 = smov 128   ;;  %s576_s23 = smov 8  }
  0x12   :  { %22 = dma.hbm_to_vmem [thread:$0]  %s726_s0, 2048, %s17_s13, [#allocation3], %s575_s22, %s575_s22, %s576_s23  }
  0x13   :  { %s577_s26 = smov [#allocation5]   ;;  %s524_s30 = scalar_lea.hbm %s727_s1, 1024 }
  0x14   :  { %s28_s27 = sshll.u32 %s577_s26, 4  ;;  %p525_p8 = scmp.ne.s32.totalorder %s727_s1, %s524_s30  ;;  %s29_s27 = int_to_ptr.vmem [resolvable:$true] %s28_s27 }
  0x15   :  { %p528_p9 = scmp.lt.u32.totalorder %s524_s30, %s727_s1 }
  0x17   :  { %p530_p10 = pnand %p528_p9, %p525_p8 }
  0x19   :  { %533 = shalt.err (!%p530_p10)
}
  0x1a   :  { %s534_s8 = scalar_lea.vmem %s29_s27, 1024  ;;  %p539_p12 = scmp.lt.s32.totalorder %s29_s27, %s29_s27 }
  0x1b   :  { %p535_p11 = scmp.ne.s32.totalorder %s29_s27, %s534_s8  ;;  %p540_p13 = scmp.lt.s32.totalorder %s534_s8, %s534_s8 }
  0x1d   :  { %p541_p0 = por %p540_p13, %p539_p12 }
  0x1f   :  { %p542_p1 = pnand %p541_p0, %p535_p11 }
  0x21   :  { %545 = shalt.err (!%p542_p1)
}
  0x22   :  { %s578_s0 = smov 64   ;;  %s579_s9 = smov 4  }
  0x23   :  { %34 = dma.hbm_to_vmem [thread:$0]  %s727_s1, 1024, %s29_s27, [#allocation6], %s578_s0, %s578_s0, %s579_s9  }
  0x24   :  { %568 = dma.done.wait [#allocation3], 2048  }
  0x25   :  { %569 = vsyncadd [#allocation3], 4294965248 }
  0x26   :  { %570 = dma.done.wait [#allocation6], 1024  }
  0x27   :  { %571 = vsyncadd [#allocation6], 4294966272  ;;  %v462_v0 = vld [vmem:[#allocation5] sm:$0xff]   ;;  %v463_v1 = vld [vmem:[#allocation5 + $0x8] sm:$0xff]  }
  0x28   :  { %407 = vmatprep.subr.bf16.mxu0 %v462_v0  ;;  %439 = vmatprep.subr.bf16.mxu1 %v462_v0  ;;  %v464_v2 = vld [vmem:[#allocation5 + $0x10] sm:$0xff]   ;;  %v465_v3 = vld [vmem:[#allocation5 + $0x18] sm:$0xff]   ;;  %v44_v4 = vld [vmem:[#allocation2] sm:$0xff] }
  0x29   :  { %408 = vmatpush3.bf16.msra.mxu0 %v462_v0  ;;  %447 = vmatpush3.bf16.msra.mxu1 %v462_v0  ;;  %v45_v5 = vld [vmem:[#allocation2 + $0x8] sm:$0xff]  ;;  %v52_v6 = vld [vmem:[#allocation2 + $0x40] sm:$0xff]  ;;  %v468_v12 = vld [vmem:[#allocation5 + $0x30] sm:$0xff]  }
  0x2a   :  { %409 = vmatprep.subr.bf16.mxu0 %v463_v1  ;;  %440 = vmatprep.subr.bf16.mxu1 %v463_v1  ;;  %v60_v7 = vpack.c.bf16 %v45_v5, %v44_v4  ;;  %v53_v8 = vld [vmem:[#allocation2 + $0x48] sm:$0xff]  ;;  %v466_v10 = vld [vmem:[#allocation5 + $0x20] sm:$0xff]   ;;  %v469_v13 = vld [vmem:[#allocation5 + $0x38] sm:$0xff]  }
  0x2b   :  { %v64_v9 = vpack.c.bf16 %v53_v8, %v52_v6  ;;  %v467_v11 = vld [vmem:[#allocation5 + $0x28] sm:$0xff]   ;;  %v46_v14 = vld [vmem:[#allocation2 + $0x10] sm:$0xff]  ;;  %v47_v15 = vld [vmem:[#allocation2 + $0x18] sm:$0xff] }
  0x2c   :  { %423 = vmatprep.mubr.bf16.mxu0 %v60_v7  ;;  %v54_v16 = vld [vmem:[#allocation2 + $0x50] sm:$0xff]  ;;  %v55_v17 = vld [vmem:[#allocation2 + $0x58] sm:$0xff]  ;;  %v48_v18 = vld [vmem:[#allocation2 + $0x20] sm:$0xff]  ;;  %v61_v22 = vpack.c.bf16 %v47_v15, %v46_v14 }
  0x2d   :  { %410 = vmatpush3.bf16.msra.mxu0 %v463_v1  ;;  %448 = vmatpush3.bf16.msra.mxu1 %v463_v1  ;;  %v49_v19 = vld [vmem:[#allocation2 + $0x28] sm:$0xff]  ;;  %v56_v20 = vld [vmem:[#allocation2 + $0x60] sm:$0xff]  ;;  %v65_v23 = vpack.c.bf16 %v55_v17, %v54_v16  ;;  %v50_v26 = vld [vmem:[#allocation2 + $0x30] sm:$0xff] }
  0x2e   :  { %411 = vmatprep.subr.bf16.mxu0 %v464_v2  ;;  %441 = vmatprep.subr.bf16.mxu1 %v464_v2  ;;  %v57_v21 = vld [vmem:[#allocation2 + $0x68] sm:$0xff]  ;;  %v62_v24 = vpack.c.bf16 %v49_v19, %v48_v18  ;;  %v51_v27 = vld [vmem:[#allocation2 + $0x38] sm:$0xff]  ;;  %v58_v28 = vld [vmem:[#allocation2 + $0x70] sm:$0xff] }
  0x2f   :  { %431 = vmatprep.mubr.bf16.mxu1 %v64_v9  ;;  %v66_v25 = vpack.c.bf16 %v57_v21, %v56_v20  ;;  %v59_v29 = vld [vmem:[#allocation2 + $0x78] sm:$0xff]  ;;  %v63_v30 = vpack.c.bf16 %v51_v27, %v50_v26  ;;  %v382_v32 = vld [vmem:[%s728_s2] ss:$0 sm:$0xff]  ;;  %s580_s2 = smov [#allocation7]  }
  0x30   :  { %v67_v31 = vpack.c.bf16 %v59_v29, %v58_v28  ;;  %s369_s13 = sshll.u32 %s580_s2, 4  ;;  %s370_s13 = int_to_ptr.vmem [resolvable:$true] %s369_s13 }
  0x31   :  { %412 = vmatpush3.bf16.msra.mxu0 %v464_v2  ;;  %449 = vmatpush3.bf16.msra.mxu1 %v464_v2  ;;  %s546_s14 = scalar_lea.vmem %s370_s13, 2048  ;;  %p551_p3 = scmp.lt.s32.totalorder %s370_s13, %s370_s13 }
  0x32   :  { %413 = vmatprep.subr.bf16.mxu0 %v465_v3  ;;  %442 = vmatprep.subr.bf16.mxu1 %v465_v3  ;;  %p547_p2 = scmp.ne.s32.totalorder %s370_s13, %s546_s14  ;;  %p552_p4 = scmp.lt.s32.totalorder %s546_s14, %s546_s14 }
  0x34   :  { %p553_p5 = por %p552_p4, %p551_p3 }
  0x35   :  { %414 = vmatpush3.bf16.msra.mxu0 %v465_v3  ;;  %450 = vmatpush3.bf16.msra.mxu1 %v465_v3 }
  0x36   :  { %415 = vmatprep.subr.bf16.mxu0 %v466_v10  ;;  %443 = vmatprep.subr.bf16.mxu1 %v466_v10  ;;  %p554_p6 = pnand %p553_p5, %p547_p2 }
  0x39   :  { %416 = vmatpush3.bf16.msra.mxu0 %v466_v10  ;;  %451 = vmatpush3.bf16.msra.mxu1 %v466_v10 }
  0x3a   :  { %417 = vmatprep.subr.bf16.mxu0 %v467_v11  ;;  %444 = vmatprep.subr.bf16.mxu1 %v467_v11 }
  0x3d   :  { %418 = vmatpush3.bf16.msra.mxu0 %v467_v11  ;;  %452 = vmatpush3.bf16.msra.mxu1 %v467_v11 }
  0x3e   :  { %419 = vmatprep.subr.bf16.mxu0 %v468_v12  ;;  %445 = vmatprep.subr.bf16.mxu1 %v468_v12 }
  0x41   :  { %420 = vmatpush3.bf16.msra.mxu0 %v468_v12  ;;  %453 = vmatpush3.bf16.msra.mxu1 %v468_v12 }
  0x42   :  { %421 = vmatprep.subr.bf16.mxu0 %v469_v13  ;;  %446 = vmatprep.subr.bf16.mxu1 %v469_v13 }
  0x45   :  { %422 = vmatpush3.bf16.msra.mxu0 %v469_v13  ;;  %454 = vmatpush3.bf16.msra.mxu1 %v469_v13 }
  0x48   :  { %424 = vmatmul.mubr.bf16.vlgmr.msra.gmra.mrb[0].mxu0 %v61_v22  ;;  %432 = vmatmul.mubr.bf16.vlgmr.msra.gmra.mrb[0].mxu1 %v65_v23 }
  0x49   :  { %427 = vmatprep.mubr.bf16.mxu0 %v62_v24  ;;  %435 = vmatprep.mubr.bf16.mxu1 %v66_v25 }
  0x50   :  { %428 = vmatmul.mubr.bf16.gmra.mrb[4].mxu0 %v63_v30  ;;  %436 = vmatmul.mubr.bf16.gmra.mrb[4].mxu1 %v67_v31 }
 0x11b   :  { %v425_v33 = vpop.f32.mrb[0].mxu0  ;;  %v433_v34 = vpop.f32.mrb[0].mxu1 }
 0x11c   :  { %v631_v35 = vadd.f32 %v425_v33, %v382_v32  ;;  %v633_v36 = vadd.f32 %v433_v34, %v382_v32  ;;  %v173_v37 = vpop.f32.mrb[1].mxu0  ;;  %v205_v38 = vpop.f32.mrb[1].mxu1 }
 0x11d   :  { %v426_v39 = vpop.f32.mrb[2].mxu0  ;;  %v434_v40 = vpop.f32.mrb[2].mxu1  ;;  %v635_v41 = vadd.f32 %v382_v32, %v173_v37  ;;  %v643_v47 = vadd.f32 %v382_v32, %v205_v38 }
 0x11e   :  { %v637_v42 = vadd.f32 %v426_v39, %v382_v32  ;;  %v176_v43 = vpop.f32.mrb[3].mxu0  ;;  %v208_v44 = vpop.f32.mrb[3].mxu1  ;;  %v246_v45 = vmul.f32 %v633_v36, %v633_v36  ;;  %v238_v46 = vmul.f32 %v631_v35, %v631_v35  ;;  %v645_v48 = vadd.f32 %v434_v40, %v382_v32 }
 0x11f   :  { %v236_v50 = vmul.f32 %v635_v41, %v635_v41  ;;  %v651_v57 = vadd.f32 %v382_v32, %v176_v43  ;;  %v653_v58 = vadd.f32 %v382_v32, %v208_v44  ;;  %v244_v60 = vmul.f32 %v643_v47, %v643_v47 }
 0x120   :  { %272 = vadd.xlane.f32.xlu0 %v246_v45  ;;  %256 = vadd.xlane.f32.xlu1 %v238_v46  ;;  %v239_v49 = vmul.f32 %v637_v42, %v637_v42  ;;  %v247_v59 = vmul.f32 %v645_v48, %v645_v48 }
 0x121   :  { %v245_v1 = vmul.f32 %v653_v58, %v653_v58  ;;  %v237_v2 = vmul.f32 %v651_v57, %v651_v57 }
 0x123   :  { %v429_v51 = vpop.f32.mrb[4].mxu0  ;;  %v437_v52 = vpop.f32.mrb[4].mxu1 }
 0x124   :  { %258 = vadd.xlane.f32.xlu1 %v239_v49  ;;  %252 = vadd.xlane.f32.xlu0 %v236_v50  ;;  %v189_v53 = vpop.f32.mrb[5].mxu0  ;;  %v221_v54 = vpop.f32.mrb[5].mxu1  ;;  %v659_v63 = vadd.f32 %v429_v51, %v382_v32  ;;  %v683_v11 = vadd.f32 %v437_v52, %v382_v32 }
 0x125   :  { %v430_v55 = vpop.f32.mrb[6].mxu0  ;;  %v438_v56 = vpop.f32.mrb[6].mxu1  ;;  %v667_v3 = vadd.f32 %v382_v32, %v189_v53  ;;  %v675_v7 = vadd.f32 %v382_v32, %v221_v54 }
 0x126   :  { %v192_v61 = vpop.f32.mrb[7].mxu0  ;;  %v224_v62 = vpop.f32.mrb[7].mxu1  ;;  %v661_v0 = vadd.f32 %v430_v55, %v382_v32  ;;  %v242_v6 = vmul.f32 %v659_v63, %v659_v63  ;;  %v685_v12 = vadd.f32 %v438_v56, %v382_v32  ;;  %v250_v16 = vmul.f32 %v683_v11, %v683_v11 }
 0x127   :  { %v669_v4 = vadd.f32 %v382_v32, %v192_v61  ;;  %v677_v8 = vadd.f32 %v382_v32, %v224_v62  ;;  %v240_v10 = vmul.f32 %v667_v3, %v667_v3  ;;  %v248_v14 = vmul.f32 %v675_v7, %v675_v7 }
 0x128   :  { %274 = vadd.xlane.f32.xlu1 %v247_v59  ;;  %268 = vadd.xlane.f32.xlu0 %v244_v60  ;;  %v243_v5 = vmul.f32 %v661_v0, %v661_v0  ;;  %v251_v15 = vmul.f32 %v685_v12, %v685_v12 }
 0x129   :  { %v241_v9 = vmul.f32 %v669_v4, %v669_v4  ;;  %v249_v13 = vmul.f32 %v677_v8, %v677_v8 }
 0x12c   :  { %270 = vadd.xlane.f32.xlu1 %v245_v1  ;;  %254 = vadd.xlane.f32.xlu0 %v237_v2 }
 0x130   :  { %266 = vadd.xlane.f32.xlu1 %v243_v5  ;;  %264 = vadd.xlane.f32.xlu0 %v242_v6 }
 0x134   :  { %262 = vadd.xlane.f32.xlu1 %v241_v9  ;;  %260 = vadd.xlane.f32.xlu0 %v240_v10 }
 0x138   :  { %278 = vadd.xlane.f32.xlu1 %v249_v13  ;;  %276 = vadd.xlane.f32.xlu0 %v248_v14 }
 0x13c   :  { %282 = vadd.xlane.f32.xlu1 %v251_v15  ;;  %280 = vadd.xlane.f32.xlu0 %v250_v16 }
 0x1ad   :  { %v273_v17 = vpop.xlane.xlu0 %272  ;;  %v257_v18 = vpop.xlane.xlu1 %256 }
 0x1ae   :  { %470 = vrsqrt.f32 %v273_v17  ;;  %vm294_vm0 = vcmp.gt.f32.partialorder %v273_v17, 0.0  ;;  %vm286_vm1 = vcmp.gt.f32.partialorder %v257_v18, 0.0 }
 0x1af   :  { %472 = vrsqrt.f32 %v257_v18 }
 0x1b1   :  { %v259_v19 = vpop.xlane.xlu1 %258  ;;  %v253_v20 = vpop.xlane.xlu0 %252 }
 0x1b2   :  { %474 = vrsqrt.f32 %v259_v19  ;;  %vm287_vm2 = vcmp.gt.f32.partialorder %v259_v19, 0.0  ;;  %vm284_vm3 = vcmp.gt.f32.partialorder %v253_v20, 0.0 }
 0x1b3   :  { %476 = vrsqrt.f32 %v253_v20 }
 0x1b5   :  { %v275_v21 = vpop.xlane.xlu1 %274  ;;  %v269_v22 = vpop.xlane.xlu0 %268 }
 0x1b6   :  { %478 = vrsqrt.f32 %v275_v21  ;;  %vm295_vm4 = vcmp.gt.f32.partialorder %v275_v21, 0.0  ;;  %vm292_vm5 = vcmp.gt.f32.partialorder %v269_v22, 0.0 }
 0x1b7   :  { %480 = vrsqrt.f32 %v269_v22 }
 0x1b8   :  { %v471_v23 = vpop.eup %470 }
 0x1b9   :  { %v473_v24 = vpop.eup %472  ;;  %v326_v25 = vsel %vm294_vm0, %v471_v23, 0.0  ;;  %v271_v26 = vpop.xlane.xlu1 %270 }
 0x1ba   :  { %v255_v27 = vpop.xlane.xlu0 %254  ;;  %v342_v28 = vmul.f32 %v326_v25, %v633_v36  ;;  %v318_v29 = vsel %vm286_vm1, %v473_v24, 0.0  ;;  %482 = vrsqrt.f32 %v271_v26  ;;  %vm293_vm6 = vcmp.gt.f32.partialorder %v271_v26, 0.0 }
 0x1bb   :  { %v334_v30 = vmul.f32 %v318_v29, %v631_v35  ;;  %484 = vrsqrt.f32 %v255_v27  ;;  %vm285_vm7 = vcmp.gt.f32.partialorder %v255_v27, 0.0 }
 0x1bc   :  { %v475_v31 = vpop.eup %474  ;;  %358 = vst [vmem:[#allocation7 + $0x50] sm:$0xff] %v342_v28 }
 0x1bd   :  { %v477_v32 = vpop.eup %476  ;;  %350 = vst [vmem:[#allocation7 + $0x10] sm:$0xff] %v334_v30  ;;  %v319_v33 = vsel %vm287_vm2, %v475_v31, 0.0  ;;  %v267_v34 = vpop.xlane.xlu1 %266 }
 0x1be   :  { %v265_v37 = vpop.xlane.xlu0 %264  ;;  %v335_v38 = vmul.f32 %v319_v33, %v637_v42  ;;  %v316_v39 = vsel %vm284_vm3, %v477_v32, 0.0  ;;  %486 = vrsqrt.f32 %v267_v34  ;;  %vm291_vm8 = vcmp.gt.f32.partialorder %v267_v34, 0.0 }
 0x1bf   :  { %v332_v36 = vmul.f32 %v316_v39, %v635_v41  ;;  %488 = vrsqrt.f32 %v265_v37  ;;  %vm290_vm9 = vcmp.gt.f32.partialorder %v265_v37, 0.0 }
 0x1c0   :  { %v479_v40 = vpop.eup %478  ;;  %351 = vst [vmem:[#allocation7 + $0x18] sm:$0xff] %v335_v38 }
 0x1c1   :  { %v481_v35 = vpop.eup %480  ;;  %348 = vst [vmem:[#allocation7] sm:$0xff] %v332_v36  ;;  %v327_v43 = vsel %vm295_vm4, %v479_v40, 0.0  ;;  %v263_v44 = vpop.xlane.xlu1 %262 }
 0x1c2   :  { %v261_v45 = vpop.xlane.xlu0 %260  ;;  %v343_v46 = vmul.f32 %v327_v43, %v645_v48  ;;  %v324_v49 = vsel %vm292_vm5, %v481_v35, 0.0  ;;  %490 = vrsqrt.f32 %v263_v44  ;;  %vm289_vm10 = vcmp.gt.f32.partialorder %v263_v44, 0.0 }
 0x1c3   :  { %v340_v42 = vmul.f32 %v324_v49, %v643_v47  ;;  %492 = vrsqrt.f32 %v261_v45  ;;  %vm288_vm11 = vcmp.gt.f32.partialorder %v261_v45, 0.0 }
 0x1c4   :  { %v483_v50 = vpop.eup %482  ;;  %359 = vst [vmem:[#allocation7 + $0x58] sm:$0xff] %v343_v46 }
 0x1c5   :  { %v485_v41 = vpop.eup %484  ;;  %356 = vst [vmem:[#allocation7 + $0x40] sm:$0xff] %v340_v42  ;;  %v325_v51 = vsel %vm293_vm6, %v483_v50, 0.0  ;;  %v279_v52 = vpop.xlane.xlu1 %278 }
 0x1c6   :  { %v277_v53 = vpop.xlane.xlu0 %276  ;;  %v341_v54 = vmul.f32 %v325_v51, %v653_v58  ;;  %v317_v55 = vsel %vm285_vm7, %v485_v41, 0.0  ;;  %494 = vrsqrt.f32 %v279_v52  ;;  %vm297_vm12 = vcmp.gt.f32.partialorder %v279_v52, 0.0 }
 0x1c7   :  { %v333_v48 = vmul.f32 %v317_v55, %v651_v57  ;;  %496 = vrsqrt.f32 %v277_v53  ;;  %vm296_vm13 = vcmp.gt.f32.partialorder %v277_v53, 0.0 }
 0x1c8   :  { %v487_v56 = vpop.eup %486  ;;  %357 = vst [vmem:[#allocation7 + $0x48] sm:$0xff] %v341_v54 }
 0x1c9   :  { %v489_v47 = vpop.eup %488  ;;  %349 = vst [vmem:[#allocation7 + $0x8] sm:$0xff] %v333_v48  ;;  %v323_v59 = vsel %vm291_vm8, %v487_v56, 0.0  ;;  %v283_v60 = vpop.xlane.xlu1 %282 }
 0x1ca   :  { %v281_v61 = vpop.xlane.xlu0 %280  ;;  %v339_v62 = vmul.f32 %v323_v59, %v661_v0  ;;  %v322_v1 = vsel %vm290_vm9, %v489_v47, 0.0  ;;  %498 = vrsqrt.f32 %v283_v60  ;;  %vm299_vm14 = vcmp.gt.f32.partialorder %v283_v60, 0.0 }
 0x1cb   :  { %v338_v58 = vmul.f32 %v322_v1, %v659_v63  ;;  %500 = vrsqrt.f32 %v281_v61  ;;  %vm298_vm15 = vcmp.gt.f32.partialorder %v281_v61, 0.0 }
 0x1cc   :  { %v491_v2 = vpop.eup %490  ;;  %355 = vst [vmem:[#allocation7 + $0x38] sm:$0xff] %v339_v62 }
 0x1cd   :  { %v493_v57 = vpop.eup %492  ;;  %354 = vst [vmem:[#allocation7 + $0x30] sm:$0xff] %v338_v58  ;;  %v321_v5 = vsel %vm289_vm10, %v491_v2, 0.0 }
 0x1ce   :  { %v337_v6 = vmul.f32 %v321_v5, %v669_v4  ;;  %v320_v9 = vsel %vm288_vm11, %v493_v57, 0.0 }
 0x1cf   :  { %v336_v10 = vmul.f32 %v320_v9, %v667_v3 }
 0x1d0   :  { %v495_v13 = vpop.eup %494  ;;  %353 = vst [vmem:[#allocation7 + $0x28] sm:$0xff] %v337_v6 }
 0x1d1   :  { %v497_v0 = vpop.eup %496  ;;  %352 = vst [vmem:[#allocation7 + $0x20] sm:$0xff] %v336_v10  ;;  %v329_v14 = vsel %vm297_vm12, %v495_v13, 0.0 }
 0x1d2   :  { %v345_v63 = vmul.f32 %v329_v14, %v677_v8  ;;  %v328_v15 = vsel %vm296_vm13, %v497_v0, 0.0 }
 0x1d3   :  { %v344_v16 = vmul.f32 %v328_v15, %v675_v7 }
 0x1d4   :  { %v499_v17 = vpop.eup %498  ;;  %361 = vst [vmem:[#allocation7 + $0x68] sm:$0xff] %v345_v63 }
 0x1d5   :  { %v501_v4 = vpop.eup %500  ;;  %360 = vst [vmem:[#allocation7 + $0x60] sm:$0xff] %v344_v16  ;;  %v331_v3 = vsel %vm299_vm14, %v499_v17, 0.0 }
 0x1d6   :  { %v347_v18 = vmul.f32 %v331_v3, %v685_v12  ;;  %v330_v19 = vsel %vm298_vm15, %v501_v4, 0.0 }
 0x1d7   :  { %v346_v20 = vmul.f32 %v330_v19, %v683_v11 }
 0x1d8   :  { %363 = vst [vmem:[#allocation7 + $0x78] sm:$0xff] %v347_v18 }
 0x1d9   :  { %362 = vst [vmem:[#allocation7 + $0x70] sm:$0xff] %v346_v20 }
 0x1da   :  { %557 = shalt.err (!%p554_p6)
}
 0x1db   :  { %s558_s17 = scalar_lea.hbm %s729_s3, 2048 }
 0x1dc   :  { %p559_p7 = scmp.ne.s32.totalorder %s729_s3, %s558_s17  ;;  %p562_p8 = scmp.lt.u32.totalorder %s558_s17, %s729_s3 }
 0x1de   :  { %p564_p9 = pnand %p562_p8, %p559_p7 }
 0x1e0   :  { %567 = shalt.err (!%p564_p9)
}
 0x1e1   :  { %375 = dma.vmem_to_hbm [thread:$0]  %s370_s13, 2048, %s729_s3, [#allocation4], %s575_s22, %s575_s22, %s576_s23  }
 0x1e2   :  { %572 = dma.done.wait [#allocation4], 2048  }
 0x1e3   :  { %573 = vsyncadd [#allocation4], 4294965248 }
 0x1e4   :  { %379 = vsyncpa [#allocation3], 1 }
 0x1e5   :  { %380 = vsyncpa [#allocation6], 1 }
 0x1e6   :  { %381 = vsyncpa [#allocation4], 1 }

</bundles_post_ra>
